<compile_context>
chip_gen: v7x
topology: tpu7x:2x2x1
jax: 0.10.0
libtpu: 0.0.40
codegen_flags: <defaults>
</compile_context>

<pallas_src>
import functools

import jax
import jax.numpy as jnp
from jax.experimental import pallas as pl
from jax.experimental.pallas import tpu as pltpu


def _cdiv(a, b):
    return (a + b - 1) // b


def _focal_kernel(logits_ref, label_ref, loss_ref, nvalid_ref, *,
                  n_channels, alpha, gamma, ignore_lb, n_rows, tile_r, mask_rows):
    j = pl.program_id(1)

    @pl.when(j == 0)
    def _():
        loss_ref[...] = jnp.zeros_like(loss_ref)
        nvalid_ref[...] = jnp.zeros_like(nvalid_ref)

    label = label_ref[...]                                  # (tile_r, 128) int32

    valid = label != ignore_lb                              # (tile_r, 128) bool
    if mask_rows:
        # Mask rows of the (possibly partial) last block along the pixel-row axis.
        rows = jax.lax.broadcasted_iota(jnp.int32, label.shape, 0) + j * tile_r
        valid = jnp.logical_and(valid, rows < n_rows)

    # ---- channel-unrolled softmax: every op is a fully packed (tile_r, 128) tile ----
    m = logits_ref[0].astype(jnp.float32)
    for c in range(1, n_channels):
        m = jnp.maximum(m, logits_ref[c].astype(jnp.float32))
    e = [jnp.exp(logits_ref[c].astype(jnp.float32) - m) for c in range(n_channels)]
    denom = e[0]
    for c in range(1, n_channels):
        denom = denom + e[c]
    inv = pl.reciprocal(denom, approx=False)                # 1 reciprocal/pixel, C muls

    def _pow_gamma(v):
        if isinstance(gamma, int) and gamma >= 0:
            if gamma == 0:
                return jnp.ones_like(v)
            out = v
            for _ in range(gamma - 1):
                out = out * v
            return out
        # TODO(synk): non-integer gamma falls back to pow (exp/log on the EUP).
        return v ** gamma

    # ---- channel-unrolled focal loss, summed over channels into one tile ----
    loss = jnp.zeros(label.shape, jnp.float32)
    for c in range(n_channels):
        p_c = e[c] * inv
        is_tgt = label == c                                 # bool one-hot (no float materialization)
        pt = jnp.where(is_tgt, p_c, 1.0 - p_c)
        a_w = jnp.where(is_tgt, alpha, 1.0 - alpha)
        loss = loss - a_w * _pow_gamma(1.0 - pt) * jnp.log(pt + 1e-12)

    loss = jnp.where(valid, loss, 0.0)

    # Vector accumulators living directly in the (grid-resident) output refs.
    loss_ref[...] += loss
    nvalid_ref[...] += valid.astype(jnp.float32)


def focal_loss(logits, label, *, alpha=0.25, gamma=2, ignore_lb=255,
               max_tile_rows=64):
    """logits: (N, C, H, W) float, label: (N, H, W) int.  Mean softmax focal loss."""
    # TODO(synk): only the default forward path (transform='softmax', reduction='mean')
    # is implemented; sigmoid transform / unreduced loss are not.
    N, C, H, W = logits.shape
    HW = H * W
    R = _cdiv(HW, 128)
    HW_pad = R * 128

    # Free reshapes (no transpose, no dtype cast => no extra HBM pass).
    logits_r = logits.reshape(N, C, HW)
    label_r = label.astype(jnp.int32).reshape(N, HW)
    if HW_pad != HW:
        logits_r = jnp.pad(logits_r, ((0, 0), (0, 0), (0, HW_pad - HW)))
        label_r = jnp.pad(label_r, ((0, 0), (0, HW_pad - HW)),
                          constant_values=ignore_lb)
    logits_r = logits_r.reshape(N, C, R, 128)
    label_r = label_r.reshape(N, R, 128)

    # Tile rows of 128 pixels; keep double-buffered logits blocks <= ~8 MiB so the
    # default scoped-VMEM limit is comfortable on v5e/v6e/v7x.
    bytes_per_row = C * 128 * logits_r.dtype.itemsize
    budget_rows = max(8, (8 * 1024 * 1024) // (2 * max(bytes_per_row, 1)))
    budget_rows = max(8, (budget_rows // 8) * 8)
    tile_cap = min(max_tile_rows, budget_rows)
    tile_r = R if R <= tile_cap else tile_cap
    grid_j = _cdiv(R, tile_r)
    mask_rows = (R % tile_r) != 0

    g = gamma
    if isinstance(g, float) and float(g).is_integer():
        g = int(g)

    kernel = functools.partial(
        _focal_kernel, n_channels=C, alpha=float(alpha), gamma=g,
        ignore_lb=int(ignore_lb), n_rows=R, tile_r=tile_r, mask_rows=mask_rows)

    loss_part, nvalid_part = pl.pallas_call(
        kernel,
        out_shape=(jax.ShapeDtypeStruct((N, tile_r, 128), jnp.float32),
                   jax.ShapeDtypeStruct((N, tile_r, 128), jnp.float32)),
        grid_spec=pltpu.PrefetchScalarGridSpec(
            num_scalar_prefetch=0,
            grid=(N, grid_j),
            in_specs=[
                pl.BlockSpec((None, C, tile_r, 128), lambda n, j: (n, 0, j, 0)),
                pl.BlockSpec((None, tile_r, 128), lambda n, j: (n, j, 0)),
            ],
            out_specs=(
                pl.BlockSpec((None, tile_r, 128), lambda n, j: (n, 0, 0)),
                pl.BlockSpec((None, tile_r, 128), lambda n, j: (n, 0, 0)),
            ),
        ),
        compiler_params=pltpu.CompilerParams(
            dimension_semantics=("parallel", "arbitrary")),
    )(logits_r, label_r)

    loss_sum = jnp.sum(loss_part)
    n_valid = jnp.sum(nvalid_part)
    return loss_sum / n_valid


def _focal_loss_ref(logits, label, *, alpha=0.25, gamma=2, ignore_lb=255):
    """Pure-JAX reference mirroring the PyTorch forward."""
    N, C, H, W = logits.shape
    ignore = (label == ignore_lb)
    n_valid = jnp.sum(~ignore)
    lbl = jnp.where(ignore, 0, label)
    probs = jax.nn.softmax(logits.astype(jnp.float32), axis=1)
    one_hot = jax.nn.one_hot(lbl, C, axis=1, dtype=jnp.float32)
    pt = jnp.where(one_hot == 1, probs, 1 - probs)
    alpha_w = alpha * one_hot + (1 - alpha) * (1 - one_hot)
    loss = -alpha_w * (1 - pt) ** gamma * jnp.log(pt + 1e-12)
    loss = jnp.where(ignore[:, None, :, :], 0.0, loss)
    return jnp.sum(loss) / n_valid.astype(jnp.float32)


if __name__ == "__main__":
    key = jax.random.PRNGKey(0)
    k1, k2, k3 = jax.random.split(key, 3)

    N, C, H, W = 2, 4, 16, 16
    logits = jax.random.normal(k1, (N, C, H, W), dtype=jnp.float32)
    label = jax.random.randint(k2, (N, H, W), 0, C, dtype=jnp.int32)
    # Mark ~10% of pixels as ignored (ignore_lb=255).
    ignore_mask = jax.random.uniform(k3, (N, H, W)) < 0.1
    label = jnp.where(ignore_mask, 255, label)

    out = jax.block_until_ready(focal_loss(logits, label))
    ref = jax.block_until_ready(_focal_loss_ref(logits, label))
    assert jnp.allclose(out, ref, rtol=1e-4, atol=1e-6), (out, ref)

    print("KERNEL_OK")
</pallas_src>

<mosaic_0001>
module attributes {stable_mosaic.version = 11 : i64} {
  func.func @_focal_kernel(%arg0: i32, %arg1: i32, %arg2: memref<1x4x2x128xf32, #tpu.memory_space<vmem>>, %arg3: memref<1x2x128xi32, #tpu.memory_space<vmem>>, %arg4: memref<1x2x128xf32, #tpu.memory_space<vmem>>, %arg5: memref<1x2x128xf32, #tpu.memory_space<vmem>>) attributes {dimension_semantics = [#tpu.dimension_semantics<parallel>, #tpu.dimension_semantics<arbitrary>], iteration_bounds = array<i64: 2, 1>, scalar_prefetch = 0 : i64, scratch_operands = 0 : i64, tpu.core_type = #tpu.core_type<tc>, window_params = [{transform_indices = @transform_0, window_bounds = array<i64: 1, 4, 2, 128>}, {transform_indices = @transform_1, window_bounds = array<i64: 1, 2, 128>}, {transform_indices = @transform_2, window_bounds = array<i64: 1, 2, 128>}, {transform_indices = @transform_3, window_bounds = array<i64: 1, 2, 128>}]} {
    %c0_i32 = arith.constant 0 : i32
    %0 = arith.cmpi eq, %arg1, %c0_i32 : i32
    %1 = arith.extui %0 : i1 to i32
    %c0_i32_0 = arith.constant 0 : i32
    %2 = arith.cmpi ne, %1, %c0_i32_0 : i32
    scf.if %2 {
      %cst_66 = arith.constant 0.000000e+00 : f32
      %127 = vector.broadcast %cst_66 : f32 to vector<2x128xf32>
      %c0_67 = arith.constant 0 : index
      %c0_68 = arith.constant 0 : index
      %c0_69 = arith.constant 0 : index
      %128 = vector.load %arg4[%c0_67, %c0_68, %c0_69] : memref<1x2x128xf32, #tpu.memory_space<vmem>>, vector<1x2x128xf32>
      %129 = vector.shape_cast %128 : vector<1x2x128xf32> to vector<2x128xf32>
      %130 = vector.shape_cast %127 : vector<2x128xf32> to vector<1x2x128xf32>
      tpu.vector_store %arg4[%c0_67, %c0_68, %c0_69], %130 {strides = array<i32>} : memref<1x2x128xf32, #tpu.memory_space<vmem>>, vector<1x2x128xf32>,
      %cst_70 = arith.constant 0.000000e+00 : f32
      %131 = vector.broadcast %cst_70 : f32 to vector<2x128xf32>
      %c0_71 = arith.constant 0 : index
      %c0_72 = arith.constant 0 : index
      %c0_73 = arith.constant 0 : index
      %132 = vector.load %arg5[%c0_71, %c0_72, %c0_73] : memref<1x2x128xf32, #tpu.memory_space<vmem>>, vector<1x2x128xf32>
      %133 = vector.shape_cast %132 : vector<1x2x128xf32> to vector<2x128xf32>
      %134 = vector.shape_cast %131 : vector<2x128xf32> to vector<1x2x128xf32>
      tpu.vector_store %arg5[%c0_71, %c0_72, %c0_73], %134 {strides = array<i32>} : memref<1x2x128xf32, #tpu.memory_space<vmem>>, vector<1x2x128xf32>,
    } else {
    }
    %c0 = arith.constant 0 : index
    %c0_1 = arith.constant 0 : index
    %c0_2 = arith.constant 0 : index
    %3 = vector.load %arg3[%c0, %c0_1, %c0_2] : memref<1x2x128xi32, #tpu.memory_space<vmem>>, vector<1x2x128xi32>
    %4 = vector.shape_cast %3 : vector<1x2x128xi32> to vector<2x128xi32>
    %c255_i32 = arith.constant 255 : i32
    %5 = vector.broadcast %c255_i32 : i32 to vector<2x128xi32>
    %6 = arith.cmpi ne, %4, %5 : vector<2x128xi32>
    %c0_3 = arith.constant 0 : index
    %c0_4 = arith.constant 0 : index
    %c0_5 = arith.constant 0 : index
    %c0_6 = arith.constant 0 : index
    %7 = vector.load %arg2[%c0_3, %c0_4, %c0_5, %c0_6] : memref<1x4x2x128xf32, #tpu.memory_space<vmem>>, vector<1x1x2x128xf32>
    %8 = vector.shape_cast %7 : vector<1x1x2x128xf32> to vector<2x128xf32>
    %c0_7 = arith.constant 0 : index
    %c1 = arith.constant 1 : index
    %c0_8 = arith.constant 0 : index
    %c0_9 = arith.constant 0 : index
    %9 = vector.load %arg2[%c0_7, %c1, %c0_8, %c0_9] : memref<1x4x2x128xf32, #tpu.memory_space<vmem>>, vector<1x1x2x128xf32>
    %10 = vector.shape_cast %9 : vector<1x1x2x128xf32> to vector<2x128xf32>
    %11 = arith.maximumf %8, %10 : vector<2x128xf32>
    %c0_10 = arith.constant 0 : index
    %c2 = arith.constant 2 : index
    %c0_11 = arith.constant 0 : index
    %c0_12 = arith.constant 0 : index
    %12 = vector.load %arg2[%c0_10, %c2, %c0_11, %c0_12] : memref<1x4x2x128xf32, #tpu.memory_space<vmem>>, vector<1x1x2x128xf32>
    %13 = vector.shape_cast %12 : vector<1x1x2x128xf32> to vector<2x128xf32>
    %14 = arith.maximumf %11, %13 : vector<2x128xf32>
    %c0_13 = arith.constant 0 : index
    %c3 = arith.constant 3 : index
    %c0_14 = arith.constant 0 : index
    %c0_15 = arith.constant 0 : index
    %15 = vector.load %arg2[%c0_13, %c3, %c0_14, %c0_15] : memref<1x4x2x128xf32, #tpu.memory_space<vmem>>, vector<1x1x2x128xf32>
    %16 = vector.shape_cast %15 : vector<1x1x2x128xf32> to vector<2x128xf32>
    %17 = arith.maximumf %14, %16 : vector<2x128xf32>
    %c0_16 = arith.constant 0 : index
    %c0_17 = arith.constant 0 : index
    %c0_18 = arith.constant 0 : index
    %c0_19 = arith.constant 0 : index
    %18 = vector.load %arg2[%c0_16, %c0_17, %c0_18, %c0_19] : memref<1x4x2x128xf32, #tpu.memory_space<vmem>>, vector<1x1x2x128xf32>
    %19 = vector.shape_cast %18 : vector<1x1x2x128xf32> to vector<2x128xf32>
    %20 = arith.subf %19, %17 : vector<2x128xf32>
    %21 = math.exp %20 : vector<2x128xf32>
    %c0_20 = arith.constant 0 : index
    %c1_21 = arith.constant 1 : index
    %c0_22 = arith.constant 0 : index
    %c0_23 = arith.constant 0 : index
    %22 = vector.load %arg2[%c0_20, %c1_21, %c0_22, %c0_23] : memref<1x4x2x128xf32, #tpu.memory_space<vmem>>, vector<1x1x2x128xf32>
    %23 = vector.shape_cast %22 : vector<1x1x2x128xf32> to vector<2x128xf32>
    %24 = arith.subf %23, %17 : vector<2x128xf32>
    %25 = math.exp %24 : vector<2x128xf32>
    %c0_24 = arith.constant 0 : index
    %c2_25 = arith.constant 2 : index
    %c0_26 = arith.constant 0 : index
    %c0_27 = arith.constant 0 : index
    %26 = vector.load %arg2[%c0_24, %c2_25, %c0_26, %c0_27] : memref<1x4x2x128xf32, #tpu.memory_space<vmem>>, vector<1x1x2x128xf32>
    %27 = vector.shape_cast %26 : vector<1x1x2x128xf32> to vector<2x128xf32>
    %28 = arith.subf %27, %17 : vector<2x128xf32>
    %29 = math.exp %28 : vector<2x128xf32>
    %c0_28 = arith.constant 0 : index
    %c3_29 = arith.constant 3 : index
    %c0_30 = arith.constant 0 : index
    %c0_31 = arith.constant 0 : index
    %30 = vector.load %arg2[%c0_28, %c3_29, %c0_30, %c0_31] : memref<1x4x2x128xf32, #tpu.memory_space<vmem>>, vector<1x1x2x128xf32>
    %31 = vector.shape_cast %30 : vector<1x1x2x128xf32> to vector<2x128xf32>
    %32 = arith.subf %31, %17 : vector<2x128xf32>
    %33 = math.exp %32 : vector<2x128xf32>
    %34 = arith.addf %21, %25 : vector<2x128xf32>
    %35 = arith.addf %34, %29 : vector<2x128xf32>
    %36 = arith.addf %35, %33 : vector<2x128xf32>
    %37 = tpu.reciprocal %36 : vector<2x128xf32> -> vector<2x128xf32>
    %cst = arith.constant 0.000000e+00 : f32
    %38 = vector.broadcast %cst : f32 to vector<2x128xf32>
    %39 = arith.mulf %21, %37 : vector<2x128xf32>
    %c0_i32_32 = arith.constant 0 : i32
    %40 = vector.broadcast %c0_i32_32 : i32 to vector<2x128xi32>
    %41 = arith.cmpi eq, %4, %40 : vector<2x128xi32>
    %cst_33 = arith.constant 1.000000e+00 : f32
    %42 = vector.broadcast %cst_33 : f32 to vector<2x128xf32>
    %43 = arith.subf %42, %39 : vector<2x128xf32>
    %44 = arith.select %41, %39, %43 : vector<2x128xi1>, vector<2x128xf32>
    %cst_34 = arith.constant 2.500000e-01 : f32
    %cst_35 = arith.constant 7.500000e-01 : f32
    %45 = vector.broadcast %cst_34 : f32 to vector<2x128xf32>
    %46 = vector.broadcast %cst_35 : f32 to vector<2x128xf32>
    %47 = arith.select %41, %45, %46 : vector<2x128xi1>, vector<2x128xf32>
    %cst_36 = arith.constant 1.000000e+00 : f32
    %48 = vector.broadcast %cst_36 : f32 to vector<2x128xf32>
    %49 = arith.subf %48, %44 : vector<2x128xf32>
    %50 = arith.mulf %49, %49 : vector<2x128xf32>
    %51 = arith.mulf %47, %50 : vector<2x128xf32>
    %cst_37 = arith.constant 9.99999996E-13 : f32
    %52 = vector.broadcast %cst_37 : f32 to vector<2x128xf32>
    %53 = arith.addf %44, %52 : vector<2x128xf32>
    %54 = math.log %53 : vector<2x128xf32>
    %55 = arith.mulf %51, %54 : vector<2x128xf32>
    %56 = arith.subf %38, %55 : vector<2x128xf32>
    %57 = arith.mulf %25, %37 : vector<2x128xf32>
    %c1_i32 = arith.constant 1 : i32
    %58 = vector.broadcast %c1_i32 : i32 to vector<2x128xi32>
    %59 = arith.cmpi eq, %4, %58 : vector<2x128xi32>
    %cst_38 = arith.constant 1.000000e+00 : f32
    %60 = vector.broadcast %cst_38 : f32 to vector<2x128xf32>
    %61 = arith.subf %60, %57 : vector<2x128xf32>
    %62 = arith.select %59, %57, %61 : vector<2x128xi1>, vector<2x128xf32>
    %cst_39 = arith.constant 2.500000e-01 : f32
    %cst_40 = arith.constant 7.500000e-01 : f32
    %63 = vector.broadcast %cst_39 : f32 to vector<2x128xf32>
    %64 = vector.broadcast %cst_40 : f32 to vector<2x128xf32>
    %65 = arith.select %59, %63, %64 : vector<2x128xi1>, vector<2x128xf32>
    %cst_41 = arith.constant 1.000000e+00 : f32
    %66 = vector.broadcast %cst_41 : f32 to vector<2x128xf32>
    %67 = arith.subf %66, %62 : vector<2x128xf32>
    %68 = arith.mulf %67, %67 : vector<2x128xf32>
    %69 = arith.mulf %65, %68 : vector<2x128xf32>
    %cst_42 = arith.constant 9.99999996E-13 : f32
    %70 = vector.broadcast %cst_42 : f32 to vector<2x128xf32>
    %71 = arith.addf %62, %70 : vector<2x128xf32>
    %72 = math.log %71 : vector<2x128xf32>
    %73 = arith.mulf %69, %72 : vector<2x128xf32>
    %74 = arith.subf %56, %73 : vector<2x128xf32>
    %75 = arith.mulf %29, %37 : vector<2x128xf32>
    %c2_i32 = arith.constant 2 : i32
    %76 = vector.broadcast %c2_i32 : i32 to vector<2x128xi32>
    %77 = arith.cmpi eq, %4, %76 : vector<2x128xi32>
    %cst_43 = arith.constant 1.000000e+00 : f32
    %78 = vector.broadcast %cst_43 : f32 to vector<2x128xf32>
    %79 = arith.subf %78, %75 : vector<2x128xf32>
    %80 = arith.select %77, %75, %79 : vector<2x128xi1>, vector<2x128xf32>
    %cst_44 = arith.constant 2.500000e-01 : f32
    %cst_45 = arith.constant 7.500000e-01 : f32
    %81 = vector.broadcast %cst_44 : f32 to vector<2x128xf32>
    %82 = vector.broadcast %cst_45 : f32 to vector<2x128xf32>
    %83 = arith.select %77, %81, %82 : vector<2x128xi1>, vector<2x128xf32>
    %cst_46 = arith.constant 1.000000e+00 : f32
    %84 = vector.broadcast %cst_46 : f32 to vector<2x128xf32>
    %85 = arith.subf %84, %80 : vector<2x128xf32>
    %86 = arith.mulf %85, %85 : vector<2x128xf32>
    %87 = arith.mulf %83, %86 : vector<2x128xf32>
    %cst_47 = arith.constant 9.99999996E-13 : f32
    %88 = vector.broadcast %cst_47 : f32 to vector<2x128xf32>
    %89 = arith.addf %80, %88 : vector<2x128xf32>
    %90 = math.log %89 : vector<2x128xf32>
    %91 = arith.mulf %87, %90 : vector<2x128xf32>
    %92 = arith.subf %74, %91 : vector<2x128xf32>
    %93 = arith.mulf %33, %37 : vector<2x128xf32>
    %c3_i32 = arith.constant 3 : i32
    %94 = vector.broadcast %c3_i32 : i32 to vector<2x128xi32>
    %95 = arith.cmpi eq, %4, %94 : vector<2x128xi32>
    %cst_48 = arith.constant 1.000000e+00 : f32
    %96 = vector.broadcast %cst_48 : f32 to vector<2x128xf32>
    %97 = arith.subf %96, %93 : vector<2x128xf32>
    %98 = arith.select %95, %93, %97 : vector<2x128xi1>, vector<2x128xf32>
    %cst_49 = arith.constant 2.500000e-01 : f32
    %cst_50 = arith.constant 7.500000e-01 : f32
    %99 = vector.broadcast %cst_49 : f32 to vector<2x128xf32>
    %100 = vector.broadcast %cst_50 : f32 to vector<2x128xf32>
    %101 = arith.select %95, %99, %100 : vector<2x128xi1>, vector<2x128xf32>
    %cst_51 = arith.constant 1.000000e+00 : f32
    %102 = vector.broadcast %cst_51 : f32 to vector<2x128xf32>
    %103 = arith.subf %102, %98 : vector<2x128xf32>
    %104 = arith.mulf %103, %103 : vector<2x128xf32>
    %105 = arith.mulf %101, %104 : vector<2x128xf32>
    %cst_52 = arith.constant 9.99999996E-13 : f32
    %106 = vector.broadcast %cst_52 : f32 to vector<2x128xf32>
    %107 = arith.addf %98, %106 : vector<2x128xf32>
    %108 = math.log %107 : vector<2x128xf32>
    %109 = arith.mulf %105, %108 : vector<2x128xf32>
    %110 = arith.subf %92, %109 : vector<2x128xf32>
    %cst_53 = arith.constant 0.000000e+00 : f32
    %111 = vector.broadcast %cst_53 : f32 to vector<2x128xf32>
    %112 = arith.select %6, %110, %111 : vector<2x128xi1>, vector<2x128xf32>
    %c0_54 = arith.constant 0 : index
    %c0_55 = arith.constant 0 : index
    %c0_56 = arith.constant 0 : index
    %113 = vector.load %arg4[%c0_54, %c0_55, %c0_56] : memref<1x2x128xf32, #tpu.memory_space<vmem>>, vector<1x2x128xf32>
    %114 = vector.shape_cast %113 : vector<1x2x128xf32> to vector<2x128xf32>
    %115 = arith.addf %114, %112 : vector<2x128xf32>
    %c0_57 = arith.constant 0 : index
    %c0_58 = arith.constant 0 : index
    %c0_59 = arith.constant 0 : index
    %116 = vector.load %arg4[%c0_57, %c0_58, %c0_59] : memref<1x2x128xf32, #tpu.memory_space<vmem>>, vector<1x2x128xf32>
    %117 = vector.shape_cast %116 : vector<1x2x128xf32> to vector<2x128xf32>
    %118 = vector.shape_cast %115 : vector<2x128xf32> to vector<1x2x128xf32>
    tpu.vector_store %arg4[%c0_57, %c0_58, %c0_59], %118 {strides = array<i32>} : memref<1x2x128xf32, #tpu.memory_space<vmem>>, vector<1x2x128xf32>,
    %c0_60 = arith.constant 0 : index
    %c0_61 = arith.constant 0 : index
    %c0_62 = arith.constant 0 : index
    %119 = vector.load %arg5[%c0_60, %c0_61, %c0_62] : memref<1x2x128xf32, #tpu.memory_space<vmem>>, vector<1x2x128xf32>
    %120 = vector.shape_cast %119 : vector<1x2x128xf32> to vector<2x128xf32>
    %121 = arith.extui %6 : vector<2x128xi1> to vector<2x128xi32>
    %122 = arith.sitofp %121 : vector<2x128xi32> to vector<2x128xf32>
    %123 = arith.addf %120, %122 : vector<2x128xf32>
    %c0_63 = arith.constant 0 : index
    %c0_64 = arith.constant 0 : index
    %c0_65 = arith.constant 0 : index
    %124 = vector.load %arg5[%c0_63, %c0_64, %c0_65] : memref<1x2x128xf32, #tpu.memory_space<vmem>>, vector<1x2x128xf32>
    %125 = vector.shape_cast %124 : vector<1x2x128xf32> to vector<2x128xf32>
    %126 = vector.shape_cast %123 : vector<2x128xf32> to vector<1x2x128xf32>
    tpu.vector_store %arg5[%c0_63, %c0_64, %c0_65], %126 {strides = array<i32>} : memref<1x2x128xf32, #tpu.memory_space<vmem>>, vector<1x2x128xf32>,
    return
  }
  func.func @transform_0(%arg0: i32, %arg1: i32) -> (i32, i32, i32, i32) {
    %c0_i32 = arith.constant 0 : i32
    %c0_i32_0 = arith.constant 0 : i32
    %c0_i32_1 = arith.constant 0 : i32
    return %arg0, %c0_i32, %arg1, %c0_i32_0 : i32, i32, i32, i32
  }
  func.func @transform_1(%arg0: i32, %arg1: i32) -> (i32, i32, i32) {
    %c0_i32 = arith.constant 0 : i32
    %c0_i32_0 = arith.constant 0 : i32
    return %arg0, %arg1, %c0_i32 : i32, i32, i32
  }
  func.func @transform_2(%arg0: i32, %arg1: i32) -> (i32, i32, i32) {
    %c0_i32 = arith.constant 0 : i32
    %c0_i32_0 = arith.constant 0 : i32
    %c0_i32_1 = arith.constant 0 : i32
    return %arg0, %c0_i32, %c0_i32_0 : i32, i32, i32
  }
  func.func @transform_3(%arg0: i32, %arg1: i32) -> (i32, i32, i32) {
    %c0_i32 = arith.constant 0 : i32
    %c0_i32_0 = arith.constant 0 : i32
    %c0_i32_1 = arith.constant 0 : i32
    return %arg0, %c0_i32, %c0_i32_0 : i32, i32, i32
  }
}

</mosaic_0001>

<bundles_post_ra>
// kernel: tpu_custom_call.1
= control target key start
LH: loop header
LB: loop body
LE: loop exit
PB: predicated region body
PF: predicated region fallthrough
CT: control target
= control target key end

     0   :  { %9 = vsyncpa [#allocation3], 0  ;;  %s1126_s0 = inlined_call_operand.hbm [shape: f32[2,4,2,128], index: 0, kind: input, shape index: {}]   ;;  %s1127_s1 = inlined_call_operand.hbm [shape: s32[2,2,128], index: 1, kind: input, shape index: {}]   ;;  %s1128_s2 = inlined_call_operand.hbm [shape: f32[2,2,128], index: 2, kind: output, shape index: {0}]   ;;  %s1129_s3 = inlined_call_operand.hbm [shape: f32[2,2,128], index: 3, kind: output, shape index: {1}]  }
   0x1   :  { %11 = vsyncpa [#allocation3 + $0x1], 0 }
   0x2   :  { %12 = vsyncpa [#allocation6], 0 }
   0x3   :  { %14 = vsyncpa [#allocation6 + $0x1], 0 }
   0x4   :  { %15 = vsyncpa [#allocation4], 0 }
   0x5   :  { %17 = vsyncpa [#allocation4 + $0x1], 0 }
   0x6   :  { %18 = vsyncpa [#allocation9], 0 }
   0x7   :  { %20 = vsyncpa [#allocation9 + $0x1], 0  ;;  %s845_s12 = smov 0   ;;  %s847_s13 = smov 0  }
   0x8   :  { %s849_s14 = smov 0   ;;  %s851_s15 = smov 0  }
   0x9   :  { %s853_s16 = smov 0   ;;  %s855_s17 = smov 0  }
   0xa LB: > { %s518_s18 = sadd.s32 4294967295, %s815_s17   ;;  %s519_s19 = sadd.s32 4294967294, %s815_s17   ;;  %s815_s17 = sphi %s855_s17, %s26_s17   ;;  %s811_s16 = sphi %s853_s16, %s1148_s16   ;;  %s807_s15 = sphi %s851_s15, %s1147_s15   ;;  %s803_s14 = sphi %s849_s14, %s1146_s14   ;;  %s799_s13 = sphi %s847_s13, %s1145_s13   ;;  %s795_s12 = sphi %s845_s12, %s1144_s12  }
   0xb   : > { %s38_s20 = sadd.s32 1, %s811_s16  ;;  %s47_s21 = sadd.s32 1, %s803_s14 }
   0xc   : > { %p40_p0 = scmp.ge.s32.totalorder %s38_s20, 2  ;;  %p54_p1 = scmp.ne.s32.totalorder %s803_s14, %s799_s13 }
   0xd   : > { %p55_p2 = scmp.eq.s32.totalorder %s815_s17, 0  ;;  %p60_p3 = scmp.ne.s32.totalorder %s799_s13, %s795_s12 }
   0xe   : > { %s1150_s20 = smov (%p40_p0, %s38_s20), 0  ;;  %p61_p5 = scmp.eq.s32.totalorder %s518_s18, 0 }
   0xf   : > { %p886_p4 = por %p55_p2, %p54_p1  ;;  %s42_s23 = ssub.s32 %s811_s16, %s1150_s20 }
  0x10   : > { %p112_p6 = scmp.eq.s32.totalorder %s518_s18, 1  ;;  %p45_p7 = scmp.eq.s32.totalorder %s42_s23, 0 }
  0x11   : > { %p892_p8 = por %p61_p5, %p60_p3  ;;  %p118_p10 = scmp.eq.s32.totalorder %s519_s19, 1 }
  0x12   : > { %p896_p9 = por %p112_p6, %p54_p1  ;;  %p565_p13 = scmp.lt.s32.totalorder %s815_s17, 2 }
  0x13   : > { %s1133_s24 = scalar_select %p892_p8, 1, 0 }
  0x14   : > { %s1134_s25 = scalar_select %p896_p9, 1, 0 }
  0x15   : > { %s901_s26 = scalar_select %p45_p7, %s803_s14, %s47_s21  }
  0x16   : > { %p903_p11 = por %p118_p10, %p60_p3  ;;  %s910_s28 = sand.u32 1, %s803_s14  }
  0x17   : > { %s522_s29 = sshll.u32 %s910_s28, 3  ;;  %s542_s30 = sshll.u32 %s811_s16, 7 }
  0x18   : > { %s1135_s27 = scalar_select %p903_p11, 1, 0 }
  0x19   : > { %s917_s6 = scalar_lea.hbm %s1126_s0, %s542_s30  ;;  %s168_s7 = scalar_lea.vmem [#allocation2], %s522_s29 }
  0x1a   : > { %s176_s8 = sshll.u32 %s168_s7, 4  ;;  %p923_p0 = pnand %p565_p13, %p886_p4  ;;  %s919_s8 = int_to_ptr.vmem [resolvable:$true] %s176_s8 }
  0x1b   : > { %s165_s10 = scalar_lea.sflag [#allocation3], %s910_s28  ;;  %s637_s11 = scalar_lea.hbm %s917_s6, 128 }
  0x1c   : > { %p638_p2 = scmp.ne.s32.totalorder %s917_s6, %s637_s11  ;;  %p639_p3 = pneg %p923_p0 }
  0x1d   : > { %s642_s21 = scalar_lea.hbm %s1126_s0, 256  ;;  %p643_p4 = scmp.lt.u32.totalorder %s917_s6, %s1126_s0 }
  0x1e   : > { %p640_p5 = pnand %p639_p3, %p638_p2  ;;  %p644_p7 = scmp.lt.u32.totalorder %s642_s21, %s637_s11 }
  0x1f   : > { %p646_p13 = scmp.lt.u32.totalorder %s637_s11, %s917_s6 }
  0x20   : > { %p641_p6 = pneg %p640_p5  ;;  %p645_p10 = por %p644_p7, %p643_p4 }
  0x22   : > { %p647_p12 = por %p646_p13, %p645_p10 }
  0x24   : > { %p648_p1 = pnand %p647_p12, %p641_p6 }
  0x26   : > { %651 = shalt.err (!%p648_p1)
}
  0x27   : > { %s652_s29 = scalar_lea.vmem %s919_s8, 128  ;;  %s817_s30 = smov [#allocation2]  }
  0x28   : > { %p653_p2 = scmp.ne.s32.totalorder %s919_s8, %s652_s29  ;;  %s657_s4 = sshll.u32 %s817_s30, 4  ;;  %s658_s4 = int_to_ptr.vmem [resolvable:$false] %s657_s4 }
  0x29   : > { %s659_s5 = scalar_lea.vmem %s658_s4, 256  ;;  %p660_p9 = scmp.lt.s32.totalorder %s919_s8, %s658_s4 }
  0x2a   : > { %p655_p5 = pnand %p653_p2, %p639_p3  ;;  %p661_p4 = scmp.lt.s32.totalorder %s659_s5, %s652_s29 }
  0x2c   : > { %p656_p11 = pneg %p655_p5  ;;  %p662_p7 = por %p661_p4, %p660_p9 }
  0x2e   : > { %p663_p10 = pnand %p662_p7, %p656_p11 }
  0x30   : > { %666 = shalt.err (!%p663_p10)
}
  0x31   : > { %s818_s7 = smov 32   ;;  %s819_s11 = smov 2  }
  0x32   : > { %554 = dma.hbm_to_vmem [thread:$0]  (!%p923_p0), %s917_s6, 128, %s919_s8, %s165_s10, %s818_s7, %s818_s7, %s819_s11  }
  0x33   : > { %p203_p12 = scmp.lt.s32.totalorder %s815_s17, 3  ;;  %s525_s18 = sshll.u32 %s910_s28, 1 }
  0x34   : > { %s526_s19 = sshll.u32 %s811_s16, 5  ;;  %p1137_p9 = scmp.ge.s32.totalorder %s815_s17, 1 }
  0x35   : > { %s968_s29 = scalar_lea.hbm %s1127_s1, %s526_s19  ;;  %s190_s30 = scalar_lea.vmem [#allocation5], %s525_s18 }
  0x36   : > { %p961_p11 = pnand %p1137_p9, %p203_p12  ;;  %s198_s4 = sshll.u32 %s190_s30, 4  ;;  %s199_s4 = int_to_ptr.vmem [resolvable:$true] %s198_s4 }
  0x37   : > { %s187_s6 = scalar_lea.sflag [#allocation6], %s910_s28  ;;  %s667_s8 = scalar_lea.hbm %s968_s29, 32 }
  0x38   : > { %s1138_s21 = scalar_select %p961_p11, 1, 0 }
  0x39   : > { %p668_p1 = scmp.ne.s32.totalorder %s968_s29, %s667_s8  ;;  %s672_s7 = scalar_lea.hbm %s1127_s1, 64 }
  0x3a   : > { %p673_p2 = scmp.lt.u32.totalorder %s968_s29, %s1127_s1  ;;  %p674_p5 = scmp.lt.u32.totalorder %s672_s7, %s667_s8 }
  0x3b   : > { %p670_p6 = pnand %p668_p1, %p639_p3  ;;  %p676_p7 = scmp.lt.u32.totalorder %s667_s8, %s968_s29 }
  0x3c   : > { %p675_p4 = por %p674_p5, %p673_p2 }
  0x3d   : > { %p671_p13 = pneg %p670_p6 }
  0x3e   : > { %p677_p10 = por %p676_p7, %p675_p4 }
  0x40   : > { %p678_p12 = pnand %p677_p10, %p671_p13 }
  0x42   : > { %681 = shalt.err (!%p678_p12)
}
  0x43   : > { %s682_s28 = scalar_lea.vmem %s199_s4, 32  ;;  %s820_s18 = smov [#allocation5]  }
  0x44   : > { %p683_p9 = scmp.ne.s32.totalorder %s199_s4, %s682_s28  ;;  %s687_s22 = sshll.u32 %s820_s18, 4  ;;  %s688_s22 = int_to_ptr.vmem [resolvable:$false] %s687_s22 }
  0x45   : > { %s689_s23 = scalar_lea.vmem %s688_s22, 64  ;;  %p690_p8 = scmp.lt.s32.totalorder %s199_s4, %s688_s22 }
  0x46   : > { %p685_p1 = pnand %p683_p9, %p639_p3  ;;  %p691_p11 = scmp.lt.s32.totalorder %s689_s23, %s682_s28 }
  0x48   : > { %p686_p6 = pneg %p685_p1  ;;  %p692_p2 = por %p691_p11, %p690_p8 }
  0x4a   : > { %p693_p5 = pnand %p692_p2, %p686_p6 }
  0x4c   : > { %696 = shalt.err (!%p693_p5)
}
  0x4d   : > { %557 = dma.hbm_to_vmem [thread:$0]  (!%p923_p0), %s968_s29, 32, %s199_s4, %s187_s6  }
  0x4e   : > { %p1139_p13 = scmp.ne.s32.totalorder %s1138_s21, 0 }
  0x4f   : > { %s993_s30 = sand.u32 (!%p1139_p13), 1, %s799_s13   ;;  %p1140_p3 = scmp.ne.s32.totalorder (!%p1139_p13), %s1133_s24, 0 }
  0x50   : > { %207 = sbr.rel (%p1139_p13) target bundleno = 196 (0xc4), region = 28  ;;  %s528_s8 = sshll.u32 (!%p1139_p13), %s993_s30, 3 }
  0x51   : > { %s210_s10 = scalar_lea.sflag (!%p1139_p13), [#allocation3], %s993_s30  ;;  %s213_s5 = scalar_lea.vmem (!%p1139_p13), [#allocation2], %s528_s8 }
  0x57   : > { %778 = dma.done.wait (%p1140_p3), %s210_s10, 128  }
  0x58   : > { %780 = vsyncadd (%p1140_p3), %s210_s10, 4294967168  ;;  %s529_s9 = sshll.u32 %s993_s30, 1  ;;  %s219_s21 = scalar_lea.sflag [#allocation6], %s993_s30 }
  0x59   : > { %s222_s29 = scalar_lea.vmem [#allocation5], %s529_s9 }
  0x5a   : > { %782 = dma.done.wait (%p1140_p3), %s219_s21, 32  }
  0x5b   : > { %784 = vsyncadd (%p1140_p3), %s219_s21, 4294967264  ;;  %s1007_s4 = scalar_lea.vmem [#allocation7], %s529_s9  ;;  %v821_v0 = vmov 0.0   ;;  %s254_s6 = scalar_lea.vmem [#allocation8], %s529_s9  ;;  %v1010_v1 = vld [vmem:[%s222_s29] sm:$0x3] }
  0x5c   : > { %259 = vst [vmem:[%s1007_s4] sm:$0x3] %v821_v0  ;;  %260 = vst [vmem:[%s254_s6] sm:$0x3] %v821_v0  ;;  %v263_v2 = vld [vmem:[%s213_s5] sm:$0x3]  ;;  %v532_v3 = vld [vmem:[%s213_s5 + $0x2] sm:$0x3] }
  0x5d   : > { %vm262_vm0 = vcmp.ne.s32.totalorder %v1010_v1, 255  ;;  %v266_v4 = vmax.f32 %v263_v2, %v532_v3  ;;  %v533_v5 = vld [vmem:[%s213_s5 + $0x4] sm:$0x3]  ;;  %v534_v6 = vld [vmem:[%s213_s5 + $0x6] sm:$0x3]  ;;  %s538_s24 = sshll.u32 %s807_s15, 5 }
  0x5e   : > { %s382_s7 = sshll.u32 %s254_s6, 4  ;;  %v535_v9 = vsel %vm262_vm0, 1.0, %v821_v0  ;;  %s1021_s28 = scalar_lea.hbm %s1129_s3, %s538_s24  ;;  %s1023_s7 = int_to_ptr.vmem [resolvable:$true] %s382_s7 }
  0x5f   : > { %v269_v7 = vmax.f32 %v266_v4, %v533_v5  ;;  %s356_s18 = scalar_lea.sflag [#allocation9], %s993_s30  ;;  %s697_s22 = scalar_lea.vmem %s1023_s7, 32 }
  0x60   : > { %p698_p8 = scmp.ne.s32.totalorder %s1023_s7, %s697_s22  ;;  %p1141_p0 = scmp.ne.s32.totalorder %s1134_s25, 0 }
  0x61   : > { %v272_v10 = vmax.f32 %v269_v7, %v534_v6  ;;  %s822_s23 = smov [#allocation8]  }
  0x62   : > { %p699_p11 = pnand %p698_p8, %p1141_p0  ;;  %s701_s8 = sshll.u32 %s822_s23, 4  ;;  %s702_s8 = int_to_ptr.vmem [resolvable:$false] %s701_s8 }
  0x63   : > { %v345_v8 = vld [vmem:[%s254_s6] sm:$0x3]  ;;  %v273_v12 = vsub.f32 %v263_v2, %v272_v10  ;;  %v276_v13 = vsub.f32 %v532_v3, %v272_v10  ;;  %v279_v14 = vsub.f32 %v533_v5, %v272_v10  ;;  %v282_v15 = vsub.f32 %v534_v6, %v272_v10  ;;  %s703_s10 = scalar_lea.vmem %s702_s8, 64  ;;  %p704_p7 = scmp.lt.s32.totalorder %s1023_s7, %s702_s8 }
  0x64   : > { %v348_v11 = vadd.f32 %v535_v9, %v345_v8  ;;  %p700_p4 = pneg %p699_p11  ;;  %p705_p10 = scmp.lt.s32.totalorder %s703_s10, %s697_s22 }
  0x66   : > { %349 = vst [vmem:[%s254_s6] sm:$0x3] %v348_v11  ;;  %p706_p12 = por %p705_p10, %p704_p7 }
  0x68   : > { %p707_p9 = pnand %p706_p12, %p700_p4 }
  0x6a   : > { %710 = shalt.err (!%p707_p9)
}
  0x6b   : > { %s711_s5 = scalar_lea.hbm %s1021_s28, 32  ;;  %s715_s29 = scalar_lea.hbm %s1129_s3, 64 }
  0x6c   : > { %p712_p1 = scmp.ne.s32.totalorder %s1021_s28, %s711_s5  ;;  %p716_p5 = scmp.lt.u32.totalorder %s1021_s28, %s1129_s3 }
  0x6d   : > { %p717_p13 = scmp.lt.u32.totalorder %s715_s29, %s711_s5  ;;  %p719_p8 = scmp.lt.u32.totalorder %s711_s5, %s1021_s28 }
  0x6e   : > { %p713_p6 = pnand %p712_p1, %p1141_p0 }
  0x6f   : > { %p718_p3 = por %p717_p13, %p716_p5 }
  0x70   : > { %p714_p2 = pneg %p713_p6 }
  0x71   : > { %p720_p11 = por %p719_p8, %p718_p3 }
  0x73   : > { %p721_p4 = pnand %p720_p11, %p714_p2 }
  0x75   : > { %724 = shalt.err (!%p721_p4)
}
  0x76   : > { %548 = dma.vmem_to_hbm [thread:$0]  (%p1141_p0), %s1023_s7, 32, %s1021_s28, %s356_s18   ;;  %v274_v16 = vmul.f32 1.442695, %v273_v12  ;;  %v277_v17 = vmul.f32 1.442695, %v276_v13  ;;  %vm290_vm1 = vcmp.eq.s32.totalorder %v1010_v1, 0 }
  0x77   : > { %v280_v18 = vmul.f32 1.442695, %v279_v14  ;;  %v283_v19 = vmul.f32 1.442695, %v282_v15  ;;  %vm303_vm2 = vcmp.eq.s32.totalorder %v1010_v1, 1  ;;  %vm316_vm3 = vcmp.eq.s32.totalorder %v1010_v1, 2  ;;  %s1076_s18 = scalar_lea.hbm %s1128_s2, %s538_s24 }
  0x78   : > { %619 = vpow2.f32 %v274_v16  ;;  %vm329_vm4 = vcmp.eq.s32.totalorder %v1010_v1, 3  ;;  %v823_v49 = vmov 0.75   ;;  %v342_v14 = vld [vmem:[%s1007_s4] sm:$0x3]  ;;  %s369_s7 = sshll.u32 %s1007_s4, 4  ;;  %s351_s22 = scalar_lea.sflag [#allocation4], %s993_s30  ;;  %s1078_s7 = int_to_ptr.vmem [resolvable:$true] %s369_s7 }
  0x79   : > { %621 = vpow2.f32 %v277_v17  ;;  %v293_v50 = vsel %vm290_vm1, 0.25, %v823_v49  ;;  %v306_v52 = vsel %vm303_vm2, 0.25, %v823_v49  ;;  %v319_v54 = vsel %vm316_vm3, 0.25, %v823_v49  ;;  %s725_s23 = scalar_lea.vmem %s1078_s7, 32  ;;  %s824_s8 = smov [#allocation7]  }
  0x7a   : > { %623 = vpow2.f32 %v280_v18  ;;  %v332_v59 = vsel %vm329_vm4, 0.25, %v823_v49  ;;  %p726_p7 = scmp.ne.s32.totalorder %s1078_s7, %s725_s23  ;;  %s729_s10 = sshll.u32 %s824_s8, 4  ;;  %s730_s10 = int_to_ptr.vmem [resolvable:$false] %s729_s10 }
  0x7b   : > { %625 = vpow2.f32 %v283_v19  ;;  %s731_s15 = scalar_lea.vmem %s730_s10, 64  ;;  %p732_p9 = scmp.lt.s32.totalorder %s1078_s7, %s730_s10 }
  0x7c   : > { %p727_p10 = pnand %p726_p7, %p1141_p0  ;;  %p733_p1 = scmp.lt.s32.totalorder %s731_s15, %s725_s23 }
  0x7e   : > { %p728_p12 = pneg %p727_p10  ;;  %p734_p6 = por %p733_p1, %p732_p9 }
  0x80   : > { %p735_p2 = pnand %p734_p6, %p728_p12 }
  0x82   : > { %v620_v20 = vpop.eup %619 }
  0x83   : > { %v622_v21 = vpop.eup %621 }
  0x84   : > { %v624_v22 = vpop.eup %623  ;;  %v285_v23 = vadd.f32 %v622_v21, %v620_v20 }
  0x85   : > { %v626_v24 = vpop.eup %625 }
  0x86   : > { %v286_v25 = vadd.f32 %v624_v22, %v285_v23 }
  0x88   : > { %v287_v26 = vadd.f32 %v626_v24, %v286_v25 }
  0x8a   : > { %627 = vrcp.f32 %v287_v26 }
  0x94   : > { %v628_v27 = vpop.eup %627 }
  0x95   : > { %v289_v28 = vmul.f32 %v628_v27, %v620_v20  ;;  %v302_v29 = vmul.f32 %v628_v27, %v622_v21  ;;  %v315_v30 = vmul.f32 %v628_v27, %v624_v22  ;;  %v328_v31 = vmul.f32 %v628_v27, %v626_v24 }
  0x97   : > { %v291_v32 = vsub.f32 1.0, %v289_v28  ;;  %v304_v33 = vsub.f32 1.0, %v302_v29  ;;  %v317_v34 = vsub.f32 1.0, %v315_v30  ;;  %v330_v35 = vsub.f32 1.0, %v328_v31 }
  0x99   : > { %v292_v36 = vsel %vm290_vm1, %v289_v28, %v291_v32  ;;  %v305_v37 = vsel %vm303_vm2, %v302_v29, %v304_v33  ;;  %v318_v38 = vsel %vm316_vm3, %v315_v30, %v317_v34  ;;  %v331_v39 = vsel %vm329_vm4, %v328_v31, %v330_v35 }
  0x9a   : > { %v297_v40 = vadd.f32 1e-12, %v292_v36  ;;  %v310_v41 = vadd.f32 1e-12, %v305_v37  ;;  %v323_v42 = vadd.f32 1e-12, %v318_v38 }
  0x9b   : > { %v336_v43 = vadd.f32 1e-12, %v331_v39  ;;  %v294_v44 = vsub.f32 1.0, %v292_v36  ;;  %v307_v45 = vsub.f32 1.0, %v305_v37  ;;  %v320_v46 = vsub.f32 1.0, %v318_v38 }
  0x9c   : > { %629 = vlog2.f32 %v297_v40  ;;  %v333_v48 = vsub.f32 1.0, %v331_v39 }
  0x9d   : > { %631 = vlog2.f32 %v310_v41  ;;  %v295_v47 = vmul.f32 %v294_v44, %v294_v44  ;;  %v308_v51 = vmul.f32 %v307_v45, %v307_v45  ;;  %v321_v53 = vmul.f32 %v320_v46, %v320_v46 }
  0x9e   : > { %633 = vlog2.f32 %v323_v42  ;;  %v334_v56 = vmul.f32 %v333_v48, %v333_v48 }
  0x9f   : > { %635 = vlog2.f32 %v336_v43  ;;  %v296_v55 = vmul.f32 %v295_v47, %v293_v50  ;;  %v309_v58 = vmul.f32 %v308_v51, %v306_v52  ;;  %v322_v62 = vmul.f32 %v321_v53, %v319_v54 }
  0xa0   : > { %v335_v5 = vmul.f32 %v334_v56, %v332_v59 }
  0xa6   : > { %v630_v57 = vpop.eup %629 }
  0xa7   : > { %v632_v60 = vpop.eup %631  ;;  %v299_v61 = vmul.f32 0.6931472, %v630_v57 }
  0xa8   : > { %v634_v63 = vpop.eup %633  ;;  %v312_v0 = vmul.f32 0.6931472, %v632_v60 }
  0xa9   : > { %v636_v2 = vpop.eup %635  ;;  %v300_v3 = vmul.f32 %v299_v61, %v296_v55  ;;  %v325_v4 = vmul.f32 0.6931472, %v634_v63 }
  0xaa   : > { %v313_v6 = vmul.f32 %v312_v0, %v309_v58  ;;  %v338_v7 = vmul.f32 0.6931472, %v636_v2 }
  0xab   : > { %v301_v8 = vsub.f32 0.0, %v300_v3  ;;  %v326_v9 = vmul.f32 %v325_v4, %v322_v62 }
  0xac   : > { %v339_v11 = vmul.f32 %v338_v7, %v335_v5 }
  0xad   : > { %v314_v10 = vsub.f32 %v301_v8, %v313_v6 }
  0xaf   : > { %v327_v12 = vsub.f32 %v314_v10, %v326_v9 }
  0xb1   : > { %v340_v13 = vsub.f32 %v327_v12, %v339_v11 }
  0xb3   : > { %v341_v15 = vsel %vm262_vm0, %v340_v13, 0.0 }
  0xb4   : > { %v343_v16 = vadd.f32 %v342_v14, %v341_v15 }
  0xb6   : > { %344 = vst [vmem:[%s1007_s4] sm:$0x3] %v343_v16 }
  0xb7   : > { %738 = shalt.err (!%p735_p2)
}
  0xb8   : > { %s739_s30 = scalar_lea.hbm %s1076_s18, 32  ;;  %s743_s5 = scalar_lea.hbm %s1128_s2, 64 }
  0xb9   : > { %p740_p5 = scmp.ne.s32.totalorder %s1076_s18, %s739_s30  ;;  %p744_p8 = scmp.lt.u32.totalorder %s1076_s18, %s1128_s2 }
  0xba   : > { %p745_p11 = scmp.lt.u32.totalorder %s743_s5, %s739_s30  ;;  %p747_p7 = scmp.lt.u32.totalorder %s739_s30, %s1076_s18 }
  0xbb   : > { %p741_p13 = pnand %p740_p5, %p1141_p0 }
  0xbc   : > { %p746_p4 = por %p745_p11, %p744_p8 }
  0xbd   : > { %p742_p3 = pneg %p741_p13 }
  0xbe   : > { %p748_p10 = por %p747_p7, %p746_p4 }
  0xc0   : > { %p749_p12 = pnand %p748_p10, %p742_p3 }
  0xc2   : > { %752 = shalt.err (!%p749_p12)
}
  0xc3   : > { %547 = dma.vmem_to_hbm [thread:$0]  (%p1141_p0), %s1078_s7, 32, %s1076_s18, %s351_s22  }
  0xc4 PF: > { %s394_s29 = sand.u32 1, %s795_s12   ;;  %p1142_p9 = scmp.ne.s32.totalorder %s1135_s27, 0 }
  0xc5   : > { %p1143_p1 = scmp.ge.s32.totalorder %s815_s17, 2  ;;  %s395_s6 = scalar_lea.sflag [#allocation4], %s394_s29 }
  0xc7   : > { %p559_p6 = pnand %p1143_p1, %p1142_p9 }
  0xc9   : > { %786 = dma.done.wait (!%p559_p6), %s395_s6, 32  }
  0xca   : > { %788 = vsyncadd (!%p559_p6), %s395_s6, 4294967264  ;;  %s404_s11 = scalar_lea.sflag [#allocation9], %s394_s29 }
  0xcb   : > { %790 = dma.done.wait (!%p559_p6), %s404_s11, 32  }
  0xcc   : > { %792 = vsyncadd (!%p559_p6), %s404_s11, 4294967264  ;;  %s26_s17 = sadd.s32 1, %s815_s17   ;;  %s1144_s12 = smov %s799_s13 }
  0xcd   : > { %p23_p2 = scmp.ge.s32.totalorder %s26_s17, 4   ;;  %s1145_s13 = smov %s803_s14 }
  0xce   : > { %s1146_s14 = smov %s901_s26  ;;  %s1147_s15 = smov %s811_s16 }
  0xcf   : > { %s1148_s16 = smov %s1150_s20  ;;  %25 = sbr.rel (!%p23_p2) target bundleno = 10 (0xa), region = 110 }
  0xd6   :  { %409 = vsyncpa [#allocation3], 1 }
  0xd7   :  { %411 = vsyncpa [#allocation3 + $0x1], 1 }
  0xd8   :  { %412 = vsyncpa [#allocation6], 1 }
  0xd9   :  { %414 = vsyncpa [#allocation6 + $0x1], 1 }
  0xda   :  { %415 = vsyncpa [#allocation4], 1 }
  0xdb   :  { %417 = vsyncpa [#allocation4 + $0x1], 1 }
  0xdc   :  { %418 = vsyncpa [#allocation9], 1 }
  0xdd   :  { %420 = vsyncpa [#allocation9 + $0x1], 1 }

</bundles_post_ra>
